<compile_context>
chip_gen: v5e
topology: v5e:2x2
jax: 0.10.0
libtpu: 0.0.40
codegen_flags: <defaults>
</compile_context>

<pallas_src>
from functools import partial

import jax
import jax.numpy as jnp
from jax.experimental import pallas as pl
from jax.experimental.pallas import tpu as pltpu


def _round_up(x, m):
    return ((x + m - 1) // m) * m


def _pick_batch_tile(b, cap=256):
    """Batch tile (multiple of 8, <= cap) chosen so ceil-div padding is small."""
    b8 = _round_up(b, 8)
    if b8 <= cap:
        return b8
    nb = -(-b8 // cap)
    return _round_up(-(-b8 // nb), 8)


# --------------------------------------------------------------------------- #
# Fused kernel: phase 0 = fc1 + batch sum/sumsq, phase 1 = fc1 + BN + ReLU + fc2
# --------------------------------------------------------------------------- #
def _generative_kernel(z_ref, w1_ref, gamma_ref, beta_ref, w2_ref, b2_ref,
                       out_ref, ssum_ref, ssq_ref, scale_ref, shift_ref,
                       *, inv_batch):
    p = pl.program_id(0)      # phase: 0 = statistics pass, 1 = output pass
    i = pl.program_id(1)      # batch tile

    @pl.when(jnp.logical_and(p == 0, i == 0))
    def _():
        ssum_ref[...] = jnp.zeros_like(ssum_ref)
        ssq_ref[...] = jnp.zeros_like(ssq_ref)

    # fc1: single K-padded bf16 MXU pass (eps and one-hot already packed in z).
    # fc1 bias omitted: it cancels exactly under train-mode BatchNorm.
    h = jnp.dot(z_ref[...].astype(jnp.bfloat16), w1_ref[...],
                preferred_element_type=jnp.float32)

    @pl.when(p == 0)
    def _():
        # Zero-padded batch rows give h == 0 -> contribute nothing to stats.
        ssum_ref[...] += jnp.sum(h, axis=0, keepdims=True)
        ssq_ref[...] += jnp.sum(h * h, axis=0, keepdims=True)

    @pl.when(jnp.logical_and(p == 1, i == 0))
    def _():
        # Fold batch statistics into a single per-feature scale/shift, once.
        mean = ssum_ref[...] * inv_batch
        var = jnp.maximum(ssq_ref[...] * inv_batch - mean * mean, 0.0)
        scale = gamma_ref[...] * jax.lax.rsqrt(var + 1e-5)
        scale_ref[...] = scale
        shift_ref[...] = beta_ref[...] - mean * scale

    @pl.when(p == 1)
    def _():
        a = jnp.maximum(h * scale_ref[...] + shift_ref[...], 0.0)   # BN + ReLU
        out_ref[...] = (jnp.dot(a.astype(jnp.bfloat16), w2_ref[...],
                                preferred_element_type=jnp.float32)
                        + b2_ref[...])


# --------------------------------------------------------------------------- #
# Wrapper
# --------------------------------------------------------------------------- #
@partial(jax.jit,
         static_argnames=("noise_dim", "num_classes", "feature_dim",
                          "batch_tile"))
def generative_forward(key, labels, w1, gamma, beta, w2, b2, *,
                       noise_dim, num_classes, feature_dim, batch_tile):
    B = labels.shape[0]
    KP, HP = w1.shape
    FP = w2.shape[1]
    TB = batch_tile
    nb = -(-B // TB)
    B_pad = nb * TB

    # eps ~ U[0,1) and one-hot labels packed into one lane-dense operand.
    eps = jax.random.uniform(key, (B, noise_dim), jnp.float32)
    onehot = jax.nn.one_hot(labels, num_classes, dtype=jnp.float32)
    z = jnp.concatenate([eps, onehot], axis=1)
    z = jnp.pad(z, ((0, B_pad - B), (0, KP - (noise_dim + num_classes))))

    vmem_bytes = int(
        2 * (TB * KP * 4 + TB * FP * 4)          # z / out double buffers
        + 2 * (KP * HP * 2 + HP * FP * 2)        # weights (double buffered)
        + 2 * (2 * HP * 4 + FP * 4)              # gamma / beta / b2
        + 4 * HP * 4                             # scratch
        + (2 << 20))                             # headroom
    vmem_bytes = min(max(vmem_bytes, 32 * 1024 * 1024), 64 * 1024 * 1024)

    out_pad = pl.pallas_call(
        partial(_generative_kernel, inv_batch=1.0 / B),
        out_shape=jax.ShapeDtypeStruct((B_pad, FP), jnp.float32),
        grid_spec=pltpu.PrefetchScalarGridSpec(
            num_scalar_prefetch=0,
            grid=(2, nb),
            in_specs=[
                pl.BlockSpec((TB, KP), lambda p, i: (i, 0)),    # z
                pl.BlockSpec((KP, HP), lambda p, i: (0, 0)),    # W1 (resident)
                pl.BlockSpec((1, HP), lambda p, i: (0, 0)),     # gamma
                pl.BlockSpec((1, HP), lambda p, i: (0, 0)),     # beta
                pl.BlockSpec((HP, FP), lambda p, i: (0, 0)),    # W2 (resident)
                pl.BlockSpec((1, FP), lambda p, i: (0, 0)),     # b2
            ],
            # Phase 0 never writes the output; map all of its steps to block
            # (0, 0) so no garbage tiles are flushed.  Phase 1: tile i -> i.
            out_specs=pl.BlockSpec((TB, FP), lambda p, i: (p * i, 0)),
            scratch_shapes=[pltpu.VMEM((1, HP), jnp.float32),   # sum
                            pltpu.VMEM((1, HP), jnp.float32),   # sumsq
                            pltpu.VMEM((1, HP), jnp.float32),   # scale
                            pltpu.VMEM((1, HP), jnp.float32)]), # shift
        compiler_params=pltpu.CompilerParams(
            dimension_semantics=("arbitrary", "arbitrary"),
            vmem_limit_bytes=vmem_bytes),
        cost_estimate=pl.CostEstimate(
            flops=2 * (2 * B_pad * KP * HP) + 2 * B_pad * HP * FP,
            transcendentals=HP,
            bytes_accessed=(2 * B_pad * KP * 4 + KP * HP * 2 + HP * FP * 2
                            + B_pad * FP * 4 + 4 * HP * 4 + FP * 4)),
    )(z, w1, gamma, beta, w2, b2)

    if B_pad == B and FP == feature_dim:
        return out_pad
    return out_pad[:B, :feature_dim]


class GenerativePallas:
    """JAX/Pallas port of the PyTorch `Generative` module (train-mode BN)."""

    def __init__(self, noise_dim, num_classes, hidden_dim, feature_dim, key):
        self.noise_dim = noise_dim
        self.num_classes = num_classes
        self.hidden_dim = hidden_dim
        self.feature_dim = feature_dim

        d_in = noise_dim + num_classes
        k1, k2, k3, k4 = jax.random.split(key, 4)

        # PyTorch-style Linear init; weights stored as (in, out) == W.T.
        lim1 = float(d_in) ** -0.5
        w1 = jax.random.uniform(k1, (d_in, hidden_dim), jnp.float32, -lim1, lim1)
        # fc1 bias drawn for init parity but unused: it cancels exactly under
        # train-mode BatchNorm (per-feature shift invariance).
        _b1 = jax.random.uniform(k2, (hidden_dim,), jnp.float32, -lim1, lim1)
        lim2 = float(hidden_dim) ** -0.5
        w2 = jax.random.uniform(k3, (hidden_dim, feature_dim), jnp.float32,
                                -lim2, lim2)
        b2 = jax.random.uniform(k4, (feature_dim,), jnp.float32, -lim2, lim2)

        # Lane-dense padded storage (zero padding keeps the math exact).
        KP = _round_up(d_in, 128)
        HP = _round_up(hidden_dim, 128)
        FP = _round_up(feature_dim, 128)

        self.w1 = (jnp.zeros((KP, HP), jnp.bfloat16)
                   .at[:d_in, :hidden_dim].set(w1.astype(jnp.bfloat16)))
        self.gamma = jnp.zeros((1, HP), jnp.float32).at[0, :hidden_dim].set(1.0)
        self.beta = jnp.zeros((1, HP), jnp.float32)
        self.w2 = (jnp.zeros((HP, FP), jnp.bfloat16)
                   .at[:hidden_dim, :feature_dim].set(w2.astype(jnp.bfloat16)))
        self.b2 = jnp.zeros((1, FP), jnp.float32).at[0, :feature_dim].set(b2)

    def __call__(self, labels, key):
        labels = jnp.asarray(labels, jnp.int32)
        tb = _pick_batch_tile(int(labels.shape[0]))
        return generative_forward(key, labels, self.w1, self.gamma, self.beta,
                                  self.w2, self.b2,
                                  noise_dim=self.noise_dim,
                                  num_classes=self.num_classes,
                                  feature_dim=self.feature_dim,
                                  batch_tile=tb)


if __name__ == "__main__":
    key = jax.random.PRNGKey(0)
    k_params, k_labels, k_eps = jax.random.split(key, 3)

    noise_dim = 8
    num_classes = 4
    hidden_dim = 32
    feature_dim = 16
    batch = 8

    model = GenerativePallas(noise_dim, num_classes, hidden_dim, feature_dim,
                             k_params)
    labels = jax.random.randint(k_labels, (batch,), 0, num_classes,
                                dtype=jnp.int32)

    out = model(labels, k_eps)
    out = jax.block_until_ready(out)

    assert out.shape == (batch, feature_dim), out.shape
    assert out.dtype == jnp.float32
    assert bool(jnp.all(jnp.isfinite(out)))
    print("KERNEL_OK")
</pallas_src>

<mosaic_0001>
module attributes {stable_mosaic.version = 11 : i64} {
  func.func @_generative_kernel(%arg0: i32, %arg1: i32, %arg2: memref<8x128xf32, #tpu.memory_space<vmem>>, %arg3: memref<128x128xbf16, #tpu.memory_space<vmem>>, %arg4: memref<1x128xf32, #tpu.memory_space<vmem>>, %arg5: memref<1x128xf32, #tpu.memory_space<vmem>>, %arg6: memref<128x128xbf16, #tpu.memory_space<vmem>>, %arg7: memref<1x128xf32, #tpu.memory_space<vmem>>, %arg8: memref<8x128xf32, #tpu.memory_space<vmem>>, %arg9: memref<1x128xf32, #tpu.memory_space<vmem>>, %arg10: memref<1x128xf32, #tpu.memory_space<vmem>>, %arg11: memref<1x128xf32, #tpu.memory_space<vmem>>, %arg12: memref<1x128xf32, #tpu.memory_space<vmem>>) attributes {dimension_semantics = [#tpu.dimension_semantics<arbitrary>, #tpu.dimension_semantics<arbitrary>], iteration_bounds = array<i64: 2, 1>, scalar_prefetch = 0 : i64, scratch_operands = 4 : i64, tpu.core_type = #tpu.core_type<tc>, window_params = [{transform_indices = @transform_0, window_bounds = array<i64: 8, 128>}, {pipeline_mode = #tpu.pipeline_mode<synchronous>, transform_indices = @transform_1, window_bounds = array<i64: 128, 128>}, {pipeline_mode = #tpu.pipeline_mode<synchronous>, transform_indices = @transform_2, window_bounds = array<i64: 1, 128>}, {pipeline_mode = #tpu.pipeline_mode<synchronous>, transform_indices = @transform_3, window_bounds = array<i64: 1, 128>}, {pipeline_mode = #tpu.pipeline_mode<synchronous>, transform_indices = @transform_4, window_bounds = array<i64: 128, 128>}, {pipeline_mode = #tpu.pipeline_mode<synchronous>, transform_indices = @transform_5, window_bounds = array<i64: 1, 128>}, {transform_indices = @transform_6, window_bounds = array<i64: 8, 128>}]} {
    %c0_i32 = arith.constant 0 : i32
    %0 = arith.cmpi eq, %arg0, %c0_i32 : i32
    %c0_i32_0 = arith.constant 0 : i32
    %1 = arith.cmpi eq, %arg1, %c0_i32_0 : i32
    %2 = arith.andi %0, %1 : i1
    %3 = arith.extui %2 : i1 to i32
    %c0_i32_1 = arith.constant 0 : i32
    %4 = arith.cmpi ne, %3, %c0_i32_1 : i32
    scf.if %4 {
      %cst_11 = arith.constant 0.000000e+00 : f32
      %20 = vector.broadcast %cst_11 : f32 to vector<1x128xf32>
      %c0_12 = arith.constant 0 : index
      %c0_13 = arith.constant 0 : index
      %21 = vector.load %arg9[%c0_12, %c0_13] : memref<1x128xf32, #tpu.memory_space<vmem>>, vector<1x128xf32>
      tpu.vector_store %arg9[%c0_12, %c0_13], %20 {strides = array<i32>} : memref<1x128xf32, #tpu.memory_space<vmem>>, vector<1x128xf32>,
      %cst_14 = arith.constant 0.000000e+00 : f32
      %22 = vector.broadcast %cst_14 : f32 to vector<1x128xf32>
      %c0_15 = arith.constant 0 : index
      %c0_16 = arith.constant 0 : index
      %23 = vector.load %arg10[%c0_15, %c0_16] : memref<1x128xf32, #tpu.memory_space<vmem>>, vector<1x128xf32>
      tpu.vector_store %arg10[%c0_15, %c0_16], %22 {strides = array<i32>} : memref<1x128xf32, #tpu.memory_space<vmem>>, vector<1x128xf32>,
    } else {
    }
    %c0 = arith.constant 0 : index
    %c0_2 = arith.constant 0 : index
    %5 = vector.load %arg2[%c0, %c0_2] : memref<8x128xf32, #tpu.memory_space<vmem>>, vector<8x128xf32>
    %6 = arith.truncf %5 : vector<8x128xf32> to vector<8x128xbf16>
    %c0_3 = arith.constant 0 : index
    %c0_4 = arith.constant 0 : index
    %7 = vector.load %arg3[%c0_3, %c0_4] : memref<128x128xbf16, #tpu.memory_space<vmem>>, vector<128x128xbf16>
    %cst = arith.constant dense<0.000000e+00> : vector<8x128xf32>
    %8 = tpu.matmul %6, %7, %cst {dimension_numbers = #tpu.dot_dimension_numbers<[1], [0], [0], [1], [0, 0, 1, 1], [], []>} : vector<8x128xbf16>, vector<128x128xbf16>, vector<8x128xf32> -> vector<8x128xf32>
    %c0_i32_5 = arith.constant 0 : i32
    %9 = arith.cmpi eq, %arg0, %c0_i32_5 : i32
    %10 = arith.extui %9 : i1 to i32
    %c0_i32_6 = arith.constant 0 : i32
    %11 = arith.cmpi ne, %10, %c0_i32_6 : i32
    scf.if %11 {
      %c0_11 = arith.constant 0 : index
      %c0_12 = arith.constant 0 : index
      %20 = vector.load %arg9[%c0_11, %c0_12] : memref<1x128xf32, #tpu.memory_space<vmem>>, vector<1x128xf32>
      %cst_13 = arith.constant dense<0.000000e+00> : vector<128xf32>
      %21 = vector.multi_reduction <add>, %8, %cst_13 [0] : vector<8x128xf32> to vector<128xf32>
      %22 = vector.shape_cast %21 : vector<128xf32> to vector<1x128xf32>
      %23 = arith.addf %20, %22 : vector<1x128xf32>
      %c0_14 = arith.constant 0 : index
      %c0_15 = arith.constant 0 : index
      %24 = vector.load %arg9[%c0_14, %c0_15] : memref<1x128xf32, #tpu.memory_space<vmem>>, vector<1x128xf32>
      tpu.vector_store %arg9[%c0_14, %c0_15], %23 {strides = array<i32>} : memref<1x128xf32, #tpu.memory_space<vmem>>, vector<1x128xf32>,
      %c0_16 = arith.constant 0 : index
      %c0_17 = arith.constant 0 : index
      %25 = vector.load %arg10[%c0_16, %c0_17] : memref<1x128xf32, #tpu.memory_space<vmem>>, vector<1x128xf32>
      %26 = arith.mulf %8, %8 : vector<8x128xf32>
      %cst_18 = arith.constant dense<0.000000e+00> : vector<128xf32>
      %27 = vector.multi_reduction <add>, %26, %cst_18 [0] : vector<8x128xf32> to vector<128xf32>
      %28 = vector.shape_cast %27 : vector<128xf32> to vector<1x128xf32>
      %29 = arith.addf %25, %28 : vector<1x128xf32>
      %c0_19 = arith.constant 0 : index
      %c0_20 = arith.constant 0 : index
      %30 = vector.load %arg10[%c0_19, %c0_20] : memref<1x128xf32, #tpu.memory_space<vmem>>, vector<1x128xf32>
      tpu.vector_store %arg10[%c0_19, %c0_20], %29 {strides = array<i32>} : memref<1x128xf32, #tpu.memory_space<vmem>>, vector<1x128xf32>,
    } else {
    }
    %c1_i32 = arith.constant 1 : i32
    %12 = arith.cmpi eq, %arg0, %c1_i32 : i32
    %c0_i32_7 = arith.constant 0 : i32
    %13 = arith.cmpi eq, %arg1, %c0_i32_7 : i32
    %14 = arith.andi %12, %13 : i1
    %15 = arith.extui %14 : i1 to i32
    %c0_i32_8 = arith.constant 0 : i32
    %16 = arith.cmpi ne, %15, %c0_i32_8 : i32
    scf.if %16 {
      %c0_11 = arith.constant 0 : index
      %c0_12 = arith.constant 0 : index
      %20 = vector.load %arg9[%c0_11, %c0_12] : memref<1x128xf32, #tpu.memory_space<vmem>>, vector<1x128xf32>
      %cst_13 = arith.constant 1.250000e-01 : f32
      %21 = vector.broadcast %cst_13 : f32 to vector<1x128xf32>
      %22 = arith.mulf %20, %21 : vector<1x128xf32>
      %c0_14 = arith.constant 0 : index
      %c0_15 = arith.constant 0 : index
      %23 = vector.load %arg10[%c0_14, %c0_15] : memref<1x128xf32, #tpu.memory_space<vmem>>, vector<1x128xf32>
      %cst_16 = arith.constant 1.250000e-01 : f32
      %24 = vector.broadcast %cst_16 : f32 to vector<1x128xf32>
      %25 = arith.mulf %23, %24 : vector<1x128xf32>
      %26 = arith.mulf %22, %22 : vector<1x128xf32>
      %27 = arith.subf %25, %26 : vector<1x128xf32>
      %cst_17 = arith.constant 0.000000e+00 : f32
      %28 = vector.broadcast %cst_17 : f32 to vector<1x128xf32>
      %29 = arith.maximumf %27, %28 : vector<1x128xf32>
      %c0_18 = arith.constant 0 : index
      %c0_19 = arith.constant 0 : index
      %30 = vector.load %arg4[%c0_18, %c0_19] : memref<1x128xf32, #tpu.memory_space<vmem>>, vector<1x128xf32>
      %cst_20 = arith.constant 9.99999974E-6 : f32
      %31 = vector.broadcast %cst_20 : f32 to vector<1x128xf32>
      %32 = arith.addf %29, %31 : vector<1x128xf32>
      %33 = math.rsqrt %32 : vector<1x128xf32>
      %34 = arith.mulf %30, %33 : vector<1x128xf32>
      %c0_21 = arith.constant 0 : index
      %c0_22 = arith.constant 0 : index
      %35 = vector.load %arg11[%c0_21, %c0_22] : memref<1x128xf32, #tpu.memory_space<vmem>>, vector<1x128xf32>
      tpu.vector_store %arg11[%c0_21, %c0_22], %34 {strides = array<i32>} : memref<1x128xf32, #tpu.memory_space<vmem>>, vector<1x128xf32>,
      %c0_23 = arith.constant 0 : index
      %c0_24 = arith.constant 0 : index
      %36 = vector.load %arg5[%c0_23, %c0_24] : memref<1x128xf32, #tpu.memory_space<vmem>>, vector<1x128xf32>
      %37 = arith.mulf %22, %34 : vector<1x128xf32>
      %38 = arith.subf %36, %37 : vector<1x128xf32>
      %c0_25 = arith.constant 0 : index
      %c0_26 = arith.constant 0 : index
      %39 = vector.load %arg12[%c0_25, %c0_26] : memref<1x128xf32, #tpu.memory_space<vmem>>, vector<1x128xf32>
      tpu.vector_store %arg12[%c0_25, %c0_26], %38 {strides = array<i32>} : memref<1x128xf32, #tpu.memory_space<vmem>>, vector<1x128xf32>,
    } else {
    }
    %c1_i32_9 = arith.constant 1 : i32
    %17 = arith.cmpi eq, %arg0, %c1_i32_9 : i32
    %18 = arith.extui %17 : i1 to i32
    %c0_i32_10 = arith.constant 0 : i32
    %19 = arith.cmpi ne, %18, %c0_i32_10 : i32
    scf.if %19 {
      %c0_11 = arith.constant 0 : index
      %c0_12 = arith.constant 0 : index
      %20 = vector.load %arg11[%c0_11, %c0_12] : memref<1x128xf32, #tpu.memory_space<vmem>>, vector<1x128xf32>
      %21 = vector.broadcast %20 : vector<1x128xf32> to vector<8x128xf32>
      %22 = arith.mulf %8, %21 : vector<8x128xf32>
      %c0_13 = arith.constant 0 : index
      %c0_14 = arith.constant 0 : index
      %23 = vector.load %arg12[%c0_13, %c0_14] : memref<1x128xf32, #tpu.memory_space<vmem>>, vector<1x128xf32>
      %24 = vector.broadcast %23 : vector<1x128xf32> to vector<8x128xf32>
      %25 = arith.addf %22, %24 : vector<8x128xf32>
      %cst_15 = arith.constant 0.000000e+00 : f32
      %26 = vector.broadcast %cst_15 : f32 to vector<8x128xf32>
      %27 = arith.maximumf %25, %26 : vector<8x128xf32>
      %28 = arith.truncf %27 : vector<8x128xf32> to vector<8x128xbf16>
      %c0_16 = arith.constant 0 : index
      %c0_17 = arith.constant 0 : index
      %29 = vector.load %arg6[%c0_16, %c0_17] : memref<128x128xbf16, #tpu.memory_space<vmem>>, vector<128x128xbf16>
      %cst_18 = arith.constant dense<0.000000e+00> : vector<8x128xf32>
      %30 = tpu.matmul %28, %29, %cst_18 {dimension_numbers = #tpu.dot_dimension_numbers<[1], [0], [0], [1], [0, 0, 1, 1], [], []>} : vector<8x128xbf16>, vector<128x128xbf16>, vector<8x128xf32> -> vector<8x128xf32>
      %c0_19 = arith.constant 0 : index
      %c0_20 = arith.constant 0 : index
      %31 = vector.load %arg7[%c0_19, %c0_20] : memref<1x128xf32, #tpu.memory_space<vmem>>, vector<1x128xf32>
      %32 = vector.broadcast %31 : vector<1x128xf32> to vector<8x128xf32>
      %33 = arith.addf %30, %32 : vector<8x128xf32>
      %c0_21 = arith.constant 0 : index
      %c0_22 = arith.constant 0 : index
      %34 = vector.load %arg8[%c0_21, %c0_22] : memref<8x128xf32, #tpu.memory_space<vmem>>, vector<8x128xf32>
      tpu.vector_store %arg8[%c0_21, %c0_22], %33 {strides = array<i32>} : memref<8x128xf32, #tpu.memory_space<vmem>>, vector<8x128xf32>,
    } else {
    }
    return
  }
  func.func @transform_0(%arg0: i32, %arg1: i32) -> (i32, i32) {
    %c0_i32 = arith.constant 0 : i32
    %c0_i32_0 = arith.constant 0 : i32
    return %arg1, %c0_i32 : i32, i32
  }
  func.func @transform_1(%arg0: i32, %arg1: i32) -> (i32, i32) {
    %c0_i32 = arith.constant 0 : i32
    %c0_i32_0 = arith.constant 0 : i32
    %c0_i32_1 = arith.constant 0 : i32
    return %c0_i32, %c0_i32_0 : i32, i32
  }
  func.func @transform_2(%arg0: i32, %arg1: i32) -> (i32, i32) {
    %c0_i32 = arith.constant 0 : i32
    %c0_i32_0 = arith.constant 0 : i32
    %c0_i32_1 = arith.constant 0 : i32
    return %c0_i32, %c0_i32_0 : i32, i32
  }
  func.func @transform_3(%arg0: i32, %arg1: i32) -> (i32, i32) {
    %c0_i32 = arith.constant 0 : i32
    %c0_i32_0 = arith.constant 0 : i32
    %c0_i32_1 = arith.constant 0 : i32
    return %c0_i32, %c0_i32_0 : i32, i32
  }
  func.func @transform_4(%arg0: i32, %arg1: i32) -> (i32, i32) {
    %c0_i32 = arith.constant 0 : i32
    %c0_i32_0 = arith.constant 0 : i32
    %c0_i32_1 = arith.constant 0 : i32
    return %c0_i32, %c0_i32_0 : i32, i32
  }
  func.func @transform_5(%arg0: i32, %arg1: i32) -> (i32, i32) {
    %c0_i32 = arith.constant 0 : i32
    %c0_i32_0 = arith.constant 0 : i32
    %c0_i32_1 = arith.constant 0 : i32
    return %c0_i32, %c0_i32_0 : i32, i32
  }
  func.func @transform_6(%arg0: i32, %arg1: i32) -> (i32, i32) {
    %0 = arith.muli %arg0, %arg1 : i32
    %c0_i32 = arith.constant 0 : i32
    %c0_i32_0 = arith.constant 0 : i32
    return %0, %c0_i32 : i32, i32
  }
}

</mosaic_0001>

<bundles_post_ra>
// kernel: generative_forward.1
= control target key start
LH: loop header
LB: loop body
LE: loop exit
PB: predicated region body
PF: predicated region fallthrough
CT: control target
= control target key end

     0   :  { %11 = vsyncpa [#allocation7], 0  ;;  %s997_s0 = inlined_call_operand.vmem [shape: f32[8,128], index: 0, kind: input, shape index: {}]   ;;  %s998_s1 = inlined_call_operand.vmem [shape: bf16[128,128], index: 1, kind: input, shape index: {}]   ;;  %s999_s2 = inlined_call_operand.vmem [shape: f32[1,128], index: 2, kind: input, shape index: {}]   ;;  %s1000_s3 = inlined_call_operand.vmem [shape: f32[1,128], index: 3, kind: input, shape index: {}]   ;;  %s1001_s4 = inlined_call_operand.hbm [shape: bf16[128,128], index: 4, kind: input, shape index: {}]   ;;  %s1002_s5 = inlined_call_operand.vmem [shape: f32[1,128], index: 5, kind: input, shape index: {}]   ;;  %s1003_s6 = inlined_call_operand.hbm [shape: f32[8,128], index: 6, kind: output, shape index: {}]  }
   0x1   :  { %12 = vsyncpa [#allocation8], 0 }
   0x2   :  { %14 = vsyncpa [#allocation8 + $0x1], 0  ;;  %s896_s21 = smov 0   ;;  %s898_s22 = smov 0  }
   0x3   :  { %s900_s23 = smov 0  }
   0x4 LB: > { %s614_s24 = sadd.s32 4294967295, %s854_s23   ;;  %s615_s25 = sadd.s32 4294967294, %s854_s23   ;;  %s854_s23 = sphi %s900_s23, %s20_s23   ;;  %s850_s22 = sphi %s898_s22, %s1006_s22   ;;  %s846_s21 = sphi %s896_s21, %s1005_s21  }
   0x5   : > { %s32_s26 = sadd.s32 1, %s850_s22  ;;  %p616_p0 = scmp.ge.s32.totalorder %s854_s23, 1 }
   0x6   : > { %p34_p1 = scmp.ge.s32.totalorder %s32_s26, 2  ;;  %p196_p2 = scmp.lt.s32.totalorder %s854_s23, 3 }
   0x7   : > { %p918_p3 = scmp.eq.s32.totalorder %s614_s24, 0  ;;  %s223_s30 = sshll.u32 %s1001_s4, 4  ;;  %s224_s30 = int_to_ptr.hbm [resolvable:$true] %s223_s30 }
   0x8   : > { %s1008_s26 = smov (%p34_p1, %s32_s26), 0  ;;  %p197_p4 = pnand %p616_p0, %p196_p2 }
   0x9   : > { %s856_s7 = smov [#allocation6]   ;;  %s857_s9 = smov 64  }
   0xa   : > { %p719_p5 = pneg %p197_p4  ;;  %s225_s8 = sshll.u32 %s856_s7, 4  ;;  %s226_s8 = int_to_ptr.vmem [resolvable:$true] %s225_s8 }
   0xb   : > { %s858_s10 = smov 4   ;;  %244 = sbr.rel (%p197_p4) target bundleno = 424 (0x1a8), region = 44 }
   0xc   : > { %p720_p6 = pnand %p918_p3, %p719_p5 }
   0xe   : > { %722 = dma.hbm_to_vmem [thread:$0]  (!%p720_p6), %s224_s30, 1024, %s226_s8, [#allocation7], %s857_s9, %s857_s9, %s858_s10  }
  0x10   : > { %837 = dma.done.wait (%p918_p3), [#allocation7], 1024  }
  0x11   : > { %839 = vsyncadd (%p918_p3), [#allocation7], 4294966272  ;;  %p279_p7 = scmp.eq.s32.totalorder %s846_s21, 0 }
  0x12   : > { %v859_v0 = vmov (%p279_p7), 0.0  }
  0x13   : > { %284 = sbr.rel (!%p279_p7) target bundleno = 24 (0x18), region = 52  ;;  %285 = vst [vmem:[#allocation2] sm:$0x1] (%p279_p7), %v859_v0 }
  0x14   : > { %286 = vst [vmem:[#allocation3] sm:$0x1] (%p279_p7), %v859_v0 }
  0x18 PF: > { %v701_v1 = vld [vmem:[%s998_s1 + $0x38] sm:$0xff]  ;;  %v700_v2 = vld [vmem:[%s998_s1 + $0x30] sm:$0xff]  ;;  %v699_v3 = vld [vmem:[%s998_s1 + $0x28] sm:$0xff]  ;;  %p654_p8 = scmp.ne.s32.totalorder %s846_s21, 0 }
  0x19   : > { %353 = vmatpush.bf16.msra.mxu0 %v701_v1  ;;  %v698_v4 = vld [vmem:[%s998_s1 + $0x20] sm:$0xff]  ;;  %v697_v5 = vld [vmem:[%s998_s1 + $0x18] sm:$0xff]  ;;  %v696_v6 = vld [vmem:[%s998_s1 + $0x10] sm:$0xff] }
  0x1a   : > { %v695_v7 = vld [vmem:[%s998_s1 + $0x8] sm:$0xff]  ;;  %v694_v8 = vld [vmem:[%s998_s1] sm:$0xff] }
  0x1b   : > { %v287_v9 = vld [vmem:[%s997_s0] sm:$0xff] }
  0x1c   : > { %v288_v10 = vpack.c.bf16 %v287_v9, %v287_v9 }
  0x1d   : > { %354 = vmatpush.bf16.msra.mxu0 %v700_v2 }
  0x21   : > { %355 = vmatpush.bf16.msra.mxu0 %v699_v3 }
  0x25   : > { %356 = vmatpush.bf16.msra.mxu0 %v698_v4 }
  0x29   : > { %357 = vmatpush.bf16.msra.mxu0 %v697_v5 }
  0x2d   : > { %358 = vmatpush.bf16.msra.mxu0 %v696_v6 }
  0x31   : > { %359 = vmatpush.bf16.msra.mxu0 %v695_v7 }
  0x35   : > { %360 = vmatpush.bf16.msra.mxu0 %v694_v8 }
  0x38   : > { %361 = vmatmul.bf16.vlgmr.msra.gmra.mxu0 %v288_v10 }
  0xb5   : > { %v961_v11 = vpop.f32.mrf.mxu0 }
  0xb9   : > { %368 = sbr.rel (%p654_p8) target bundleno = 207 (0xcf), region = 56 }
  0xbd   : > { %v364_v12 = vpop.f32.mrf.mxu0 }
  0xbe   : > { %v370_v13 = vrot.slane %v961_v11, 4  ;;  %v379_v14 = vmul.f32 %v961_v11, %v961_v11  ;;  %v369_v23 = vld [vmem:[#allocation2] sm:$0x1]  ;;  %v378_v26 = vld [vmem:[#allocation3] sm:$0x1] }
  0xc0   : > { %v371_v15 = vadd.f32 %v370_v13, %v961_v11  ;;  %v380_v16 = vrot.slane %v379_v14, 4 }
  0xc2   : > { %v372_v17 = vrot.slane %v371_v15, 2  ;;  %v381_v18 = vadd.f32 %v380_v16, %v379_v14 }
  0xc4   : > { %v373_v19 = vadd.f32 %v372_v17, %v371_v15  ;;  %v382_v20 = vrot.slane %v381_v18, 2 }
  0xc6   : > { %v374_v21 = vrot.slane %v373_v19, 1  ;;  %v383_v22 = vadd.f32 %v382_v20, %v381_v18 }
  0xc8   : > { %v375_v24 = vadd.f32 %v374_v21, %v373_v19  ;;  %v384_v25 = vrot.slane %v383_v22, 1 }
  0xca   : > { %v376_v27 = vadd.f32 %v375_v24, %v369_v23  ;;  %v385_v28 = vadd.f32 %v384_v25, %v383_v22 }
  0xcc   : > { %377 = vst [vmem:[#allocation2] sm:$0x1] %v376_v27  ;;  %v386_v29 = vadd.f32 %v385_v28, %v378_v26 }
  0xce   : > { %387 = vst [vmem:[#allocation3] sm:$0x1] %v386_v29 }
  0xcf PF: > { %p388_p9 = scmp.eq.s32.totalorder %s846_s21, 1 }
  0xd0   : > { %v400_v43 = vld [vmem:[%s999_s2] sm:$0x1] (%p388_p9) }
  0xd1   : > { %392 = sbr.rel (!%p388_p9) target bundleno = 247 (0xf7), region = 60  ;;  %v414_v47 = vld [vmem:[%s1000_s3] sm:$0x1] (%p388_p9) }
  0xd3   : > { %v393_v30 = vld [vmem:[#allocation2] sm:$0x1] (%p388_p9) }
  0xd4   : > { %v394_v32 = vmul.f32 (%p388_p9), 0.125, %v393_v30 }
  0xd5   : > { %v395_v31 = vld [vmem:[#allocation3] sm:$0x1] (%p388_p9) }
  0xd6   : > { %v396_v33 = vmul.f32 0.125, %v395_v31  ;;  %v397_v34 = vmul.f32 %v394_v32, %v394_v32 }
  0xd8   : > { %v398_v35 = vsub.f32 %v396_v33, %v397_v34 }
  0xda   : > { %v399_v36 = vmax.f32 %v398_v35, 0.0 }
  0xdc   : > { %v401_v37 = vadd.f32 1e-05, %v399_v36 }
  0xde   : > { %761 = vrsqrt.f32 %v401_v37  ;;  %vm408_vm0 = vweird.f32 %v401_v37 }
  0xe4   : > { %v762_v38 = vpop.eup %761 }
  0xe5   : > { %v403_v39 = vmul.f32 %v762_v38, %v401_v37  ;;  %vm409_vm1 = vweird.f32 %v762_v38 }
  0xe6   : > { %vm410_vm2 = vmor %vm408_vm0, %vm409_vm1 }
  0xe7   : > { %v404_v40 = vmul.f32 %v762_v38, %v403_v39 }
  0xe9   : > { %v405_v41 = vmul.f32 0.5, %v404_v40 }
  0xeb   : > { %v406_v42 = vsub.f32 1.5, %v405_v41 }
  0xed   : > { %v407_v44 = vmul.f32 %v762_v38, %v406_v42 }
  0xef   : > { %v411_v45 = vsel %vm410_vm2, %v762_v38, %v407_v44 }
  0xf0   : > { %v412_v46 = vmul.f32 %v411_v45, %v400_v43 }
  0xf2   : > { %413 = vst [vmem:[#allocation4] sm:$0x1] %v412_v46  ;;  %v415_v48 = vmul.f32 %v412_v46, %v394_v32 }
  0xf4   : > { %v416_v49 = vsub.f32 %v414_v47, %v415_v48 }
  0xf6   : > { %417 = vst [vmem:[#allocation5] sm:$0x1] %v416_v49 }
  0xf7 PF: > { %p656_p10 = scmp.ne.s32.totalorder %s846_s21, 1 }
  0xf9   : > { %420 = sbr.rel (%p656_p10) target bundleno = 420 (0x1a4), region = 64 }
  0xfe   : > { %v710_v50 = vld [vmem:[#allocation6 + $0x38] sm:$0xff]  ;;  %v709_v51 = vld [vmem:[#allocation6 + $0x30] sm:$0xff]  ;;  %v708_v52 = vld [vmem:[#allocation6 + $0x28] sm:$0xff] }
  0xff   : > { %501 = vmatpush.bf16.msra.mxu0 %v710_v50  ;;  %v707_v53 = vld [vmem:[#allocation6 + $0x20] sm:$0xff]  ;;  %v763_v54 = vld [vmem:[#allocation4] ss:$0 sm:$0xff]  ;;  %v764_v57 = vld [vmem:[#allocation5] ss:$0 sm:$0xff] }
 0x100   : > { %v706_v55 = vld [vmem:[#allocation6 + $0x18] sm:$0xff]  ;;  %v425_v56 = vmul.f32 %v763_v54, %v961_v11  ;;  %v705_v58 = vld [vmem:[#allocation6 + $0x10] sm:$0xff]  ;;  %v704_v60 = vld [vmem:[#allocation6 + $0x8] sm:$0xff] }
 0x101   : > { %v703_v62 = vld [vmem:[#allocation6] sm:$0xff]  ;;  %v765_v0 = vld [vmem:[%s1002_s5] ss:$0 sm:$0xff] }
 0x102   : > { %v430_v59 = vadd.f32 %v764_v57, %v425_v56 }
 0x103   : > { %502 = vmatpush.bf16.msra.mxu0 %v709_v51 }
 0x104   : > { %v431_v61 = vmax.f32 %v430_v59, 0.0 }
 0x106   : > { %v432_v63 = vpack.c.bf16 %v431_v61, %v431_v61 }
 0x107   : > { %503 = vmatpush.bf16.msra.mxu0 %v708_v52 }
 0x10b   : > { %504 = vmatpush.bf16.msra.mxu0 %v707_v53 }
 0x10f   : > { %505 = vmatpush.bf16.msra.mxu0 %v706_v55 }
 0x113   : > { %506 = vmatpush.bf16.msra.mxu0 %v705_v58 }
 0x117   : > { %507 = vmatpush.bf16.msra.mxu0 %v704_v60 }
 0x11b   : > { %508 = vmatpush.bf16.msra.mxu0 %v703_v62 }
 0x11e   : > { %509 = vmatmul.bf16.vlgmr.msra.gmra.mxu0 %v432_v63 }
 0x19b   : > { %v510_v1 = vpop.f32.mrf.mxu0 }
 0x19c   : > { %v511_v2 = vadd.f32 %v765_v0, %v510_v1 }
 0x19e   : > { %514 = vst [vmem:[#allocation9] sm:$0xff] %v511_v2 }
 0x1a3   : > { %v512_v3 = vpop.f32.mrf.mxu0 }
 0x1a4 PF: > { %p729_p11 = scmp.eq.s32.totalorder %s614_s24, 1  ;;  %s531_s18 = sshll.u32 %s1003_s6, 4  ;;  %s532_s18 = int_to_ptr.hbm [resolvable:$true] %s531_s18 }
 0x1a5   : > { %s860_s19 = smov [#allocation9]  }
 0x1a6   : > { %s529_s20 = sshll.u32 %s860_s19, 4  ;;  %s530_s20 = int_to_ptr.vmem [resolvable:$true] %s529_s20 }
 0x1a7   : > { %716 = dma.vmem_to_hbm [thread:$0]  (%p729_p11), %s530_s20, 128, %s532_s18, [#allocation8]  }
 0x1a8 PF: > { %p730_p12 = scmp.ge.s32.totalorder %s854_s23, 2  ;;  %p731_p13 = scmp.eq.s32.totalorder %s615_s25, 1 }
 0x1aa   : > { %p724_p0 = pnand %p731_p13, %p730_p12 }
 0x1ac   : > { %p725_p1 = pneg %p724_p0 }
 0x1ae   : > { %841 = dma.done.wait (%p725_p1), [#allocation8], 128  }
 0x1af   : > { %843 = vsyncadd (%p725_p1), [#allocation8], 4294967168  ;;  %s20_s23 = sadd.s32 1, %s854_s23   ;;  %s1005_s21 = smov %s850_s22 }
 0x1b0   : > { %p17_p2 = scmp.ge.s32.totalorder %s20_s23, 4   ;;  %s1006_s22 = smov %s1008_s26 }
 0x1b2   :  { %19 = sbr.rel (!%p17_p2) target bundleno = 4 (0x4), region = 100 }
 0x1b7   :  { %550 = vsyncpa [#allocation7], 1 }
 0x1b8   :  { %552 = vsyncpa [#allocation7 + $0x1], 1 }
 0x1b9   :  { %553 = vsyncpa [#allocation8], 1 }
 0x1ba   :  { %555 = vsyncpa [#allocation8 + $0x1], 1 }

</bundles_post_ra>
